<compile_context>
chip_gen: v6e
topology: v6e:2x2x1
jax: 0.10.0
libtpu: 0.0.40
codegen_flags: <defaults>
</compile_context>

<pallas_src>
import functools

import jax
import jax.numpy as jnp
from jax.experimental import pallas as pl
from jax.experimental.pallas import tpu as pltpu

EPS = 1e-5  # nn.InstanceNorm2d default


def _round_up(x, m):
    return (x + m - 1) // m * m


def _space_to_depth(xp, s):
    """(N, C, Hp, Wp) -> (N, C*s*s, ceil(Hp/s), ceil(Wp/s)); channel order (c, ry, rx)."""
    if s == 1:
        return xp
    N, C, Hp, Wp = xp.shape
    Hq, Wq = -(-Hp // s), -(-Wp // s)
    xp = jnp.pad(xp, ((0, 0), (0, 0), (0, s * Hq - Hp), (0, s * Wq - Wp)))
    xu = xp.reshape(N, C, Hq, s, Wq, s).transpose(0, 1, 3, 5, 2, 4)
    return xu.reshape(N, C * s * s, Hq, Wq)


def _space_to_depth_weight(w, s):
    """(Co, Ci, K, K) -> (Co, Ci*s*s, ceil(K/s), ceil(K/s)); matches _space_to_depth."""
    if s == 1:
        return w
    Co, Ci, K, _ = w.shape
    Kq = -(-K // s)
    w = jnp.pad(w, ((0, 0), (0, 0), (0, s * Kq - K), (0, s * Kq - K)))
    wu = w.reshape(Co, Ci, Kq, s, Kq, s).transpose(0, 1, 3, 5, 2, 4)
    return wu.reshape(Co, Ci * s * s, Kq, Kq)


def _make_kernel(B, Cs, Kq, Wq, L_out, inv_hw):
    """Per-grid-step kernel: fused conv matmul + per-image InstanceNorm + ReLU."""

    def kernel(x_ref, w_ref, m_ref, o_ref, stg_ref):
        # x_ref:   (B, Cs, Lin)      flattened, channel- and lane-padded input
        # w_ref:   (Cop, KK*Cs)      weights, contraction dim minor
        # m_ref:   (1, L_out)        1.0 on the Ho*Wo kept columns, else 0.0
        # o_ref:   (B, Cop, L_out)   normalized + ReLU output (flat, padded)
        # stg_ref: (KK*Cs, B*L_out)  staging operand for the fused contraction
        for b in range(B):
            xb = x_ref[b]                                    # (Cs, Lin)
            col = b * L_out
            for dy in range(Kq):
                for dx in range(Kq):
                    t = dy * Kq + dx
                    off = dy * Wq + dx                       # static offsets
                    stg_ref[t * Cs:(t + 1) * Cs, col:col + L_out] = (
                        xb[:, off:off + L_out])

        # One MXU contraction for the whole conv (all taps, all B images).
        acc = jnp.dot(w_ref[...], stg_ref[...],
                      preferred_element_type=jnp.float32)    # (Cop, B*L_out)

        # InstanceNorm2d (affine=False) per image over kept columns, then ReLU.
        m = m_ref[...].astype(jnp.float32)                   # (1, L_out)
        for b in range(B):
            ab = acc[:, b * L_out:(b + 1) * L_out]           # lane-aligned slice
            mean = jnp.sum(ab * m, axis=1, keepdims=True) * inv_hw
            ex2 = jnp.sum(ab * ab * m, axis=1, keepdims=True) * inv_hw
            var = jnp.maximum(ex2 - mean * mean, 0.0)        # guard cancellation
            y = (ab - mean) * jax.lax.rsqrt(var + EPS)
            # NOTE: seam/pad columns hold un-normalized junk; the wrapper strips
            # them — never consume o_ref / out_flat directly.
            o_ref[b] = jnp.maximum(y, 0.0).astype(o_ref.dtype)

    return kernel


@functools.partial(jax.jit,
                   static_argnames=("stride", "padding", "batch_block",
                                    "compute_dtype"))
def conv_block(x, weight, bias=None, *, stride=1, padding=1, batch_block=None,
               compute_dtype=None):
    """ConvBlock forward: reflect-pad Conv2d -> InstanceNorm2d(affine=False) -> ReLU.

    x: (N, C_in, H, W); weight: (C_out, C_in, K, K).
    `bias` is accepted for API parity but unused: InstanceNorm's per-channel
    mean subtraction cancels any per-channel conv bias exactly.
    `compute_dtype=jnp.bfloat16` feeds the MXU natively (accumulation stays f32).
    """
    del bias  # mathematically cancelled by InstanceNorm (affine=False)
    N, C_in, H, W = x.shape
    C_out, _, K, _ = weight.shape
    s = stride

    # Reflect pad (padding_mode='reflect'); output sizes of the strided conv.
    xp = jnp.pad(x, ((0, 0), (0, 0), (padding, padding), (padding, padding)),
                 mode="reflect")
    Hp, Wp = H + 2 * padding, W + 2 * padding
    Ho, Wo = (Hp - K) // s + 1, (Wp - K) // s + 1

    # Space-to-depth so the kernel always runs a stride-1 conv over exactly the
    # kept output positions (no 4x overcompute / strided gather for down blocks).
    xu = _space_to_depth(xp, s)                     # (N, C_u, Hq, Wq)
    wu = _space_to_depth_weight(weight, s)          # (C_out, C_u, Kq, Kq)
    _, C_u, Hq, Wq = xu.shape
    Kq = wu.shape[-1]
    KK = Kq * Kq
    Hf = Hq - Kq + 1                                # flat-output rows (>= Ho)

    cdt = jnp.dtype(compute_dtype) if compute_dtype is not None else x.dtype
    Cs = _round_up(C_u, 8)                          # sublane-aligned slab height
    Cop = _round_up(C_out, 8)

    # Lane-dense flat sizes; every shifted slice of length L_out stays in bounds.
    L_raw = Hf * Wq
    L_out = _round_up(L_raw, 128)
    Lin = _round_up(max(Hq * Wq, (Kq - 1) * (Wq + 1) + L_out), 128)

    # Flattened, channel-padded (C_u -> Cs) and lane-padded input.
    x_flat = jnp.pad(xu.reshape(N, C_u, Hq * Wq).astype(cdt),
                     ((0, 0), (0, Cs - C_u), (0, Lin - Hq * Wq)))

    # Weights (C_out, C_u, Kq, Kq) -> (Cop, KK*Cs), contraction dim minor; tap
    # t = dy*Kq + dx occupies columns [t*Cs, t*Cs + C_u) (pad columns are zero).
    w_slab = jnp.transpose(wu, (0, 2, 3, 1)).reshape(C_out, KK, C_u)
    w_slab = jnp.pad(w_slab, ((0, Cop - C_out), (0, 0), (0, Cs - C_u)))
    w_slab = w_slab.reshape(Cop, KK * Cs).astype(cdt)

    # Keep-mask over the flat columns: column j = r*Wq + c is a real output iff
    # r < Ho and c < Wo (seam columns / extra rows excluded from the stats).
    rows = jnp.arange(Hf)[:, None]
    cols = jnp.arange(Wq)[None, :]
    valid = (rows < Ho) & (cols < Wo)
    mask = jnp.pad(valid.reshape(1, L_raw).astype(jnp.float32),
                   ((0, 0), (0, L_out - L_raw)))

    # Batch blocking: amortize the per-grid-step pipeline/DMA overhead.
    B = batch_block if batch_block is not None else min(max(N, 1), 8)
    N_pad = _round_up(N, B)
    if N_pad != N:
        x_flat = jnp.pad(x_flat, ((0, N_pad - N), (0, 0), (0, 0)))

    kernel = _make_kernel(B, Cs, Kq, Wq, L_out, 1.0 / float(Ho * Wo))

    out_flat = pl.pallas_call(
        kernel,
        out_shape=jax.ShapeDtypeStruct((N_pad, Cop, L_out), x.dtype),
        grid_spec=pltpu.PrefetchScalarGridSpec(
            num_scalar_prefetch=0,
            grid=(N_pad // B,),
            in_specs=[
                pl.BlockSpec((B, Cs, Lin), lambda n: (n, 0, 0)),
                pl.BlockSpec((Cop, KK * Cs), lambda n: (0, 0)),
                pl.BlockSpec((1, L_out), lambda n: (0, 0)),
            ],
            out_specs=pl.BlockSpec((B, Cop, L_out), lambda n: (n, 0, 0)),
            scratch_shapes=[pltpu.VMEM((KK * Cs, B * L_out), cdt)],
        ),
        compiler_params=pltpu.CompilerParams(
            dimension_semantics=("parallel",),
            vmem_limit_bytes=48 * 1024 * 1024),
    )(x_flat, w_slab, mask)

    # Strip channel/lane padding and seam columns; restore (N, C_out, Ho, Wo).
    out = out_flat[:N, :C_out, :L_raw].reshape(N, C_out, Hf, Wq)
    return out[:, :, :Ho, :Wo]


def _reference(x, weight, bias, *, stride=1, padding=1):
    """Pure-JAX reference of ConvBlock forward (bias kept to verify it cancels)."""
    xp = jnp.pad(x, ((0, 0), (0, 0), (padding, padding), (padding, padding)),
                 mode="reflect")
    dn = jax.lax.conv_dimension_numbers(xp.shape, weight.shape,
                                        ("NCHW", "OIHW", "NCHW"))
    y = jax.lax.conv_general_dilated(xp, weight, (stride, stride), "VALID",
                                     dimension_numbers=dn)
    y = y + bias[None, :, None, None]
    mean = y.mean(axis=(2, 3), keepdims=True)
    var = ((y - mean) ** 2).mean(axis=(2, 3), keepdims=True)
    y = (y - mean) * jax.lax.rsqrt(var + EPS)
    return jnp.maximum(y, 0.0)


if __name__ == "__main__":
    # ConvBlock(in_channels=4, out_channels=8, down=True, use_act=True,
    #           kernel_size=3, stride=1, padding=1)
    N, C_in, H, W = 2, 4, 16, 16
    C_out, K = 8, 3

    key = jax.random.PRNGKey(0)
    kx, kw, kb = jax.random.split(key, 3)
    x = jax.random.normal(kx, (N, C_in, H, W), dtype=jnp.float32)

    fan_in = C_in * K * K
    bound = 1.0 / (fan_in ** 0.5)
    weight = jax.random.uniform(kw, (C_out, C_in, K, K), jnp.float32,
                                -bound, bound)
    bias = jax.random.uniform(kb, (C_out,), jnp.float32, -bound, bound)

    # stride=1 block
    out = jax.block_until_ready(conv_block(x, weight, bias, stride=1, padding=1))
    ref = _reference(x, weight, bias, stride=1, padding=1)
    assert out.shape == (N, C_out, H, W)
    assert jnp.allclose(out, ref, atol=1e-4, rtol=1e-4), (
        float(jnp.max(jnp.abs(out - ref))))

    # stride=2 "down" block (same weights); computed via space-to-depth, no 4x overcompute.
    out2 = jax.block_until_ready(conv_block(x, weight, bias, stride=2, padding=1))
    ref2 = _reference(x, weight, bias, stride=2, padding=1)
    assert out2.shape == (N, C_out, H // 2, W // 2)
    assert jnp.allclose(out2, ref2, atol=1e-4, rtol=1e-4), (
        float(jnp.max(jnp.abs(out2 - ref2))))

    # bf16 MXU path (native on v6e/v7x); accumulation stays f32, looser tolerance.
    out3 = jax.block_until_ready(
        conv_block(x, weight, bias, stride=1, padding=1,
                   compute_dtype=jnp.bfloat16))
    assert out3.shape == (N, C_out, H, W)
    assert jnp.allclose(out3, ref, atol=5e-2, rtol=5e-2), (
        float(jnp.max(jnp.abs(out3 - ref))))

    print("KERNEL_OK")
</pallas_src>

<mosaic_0001>
module attributes {stable_mosaic.version = 11 : i64} {
  func.func @kernel(%arg0: i32, %arg1: memref<2x8x512xf32, #tpu.memory_space<vmem>>, %arg2: memref<8x72xf32, #tpu.memory_space<vmem>>, %arg3: memref<1x384xf32, #tpu.memory_space<vmem>>, %arg4: memref<2x8x384xf32, #tpu.memory_space<vmem>>, %arg5: memref<72x768xf32, #tpu.memory_space<vmem>>) attributes {dimension_semantics = [#tpu.dimension_semantics<parallel>], iteration_bounds = array<i64: 1>, scalar_prefetch = 0 : i64, scratch_operands = 1 : i64, tpu.core_type = #tpu.core_type<tc>, window_params = [{transform_indices = @transform_0, window_bounds = array<i64: 2, 8, 512>}, {pipeline_mode = #tpu.pipeline_mode<synchronous>, transform_indices = @transform_1, window_bounds = array<i64: 8, 72>}, {pipeline_mode = #tpu.pipeline_mode<synchronous>, transform_indices = @transform_2, window_bounds = array<i64: 1, 384>}, {transform_indices = @transform_3, window_bounds = array<i64: 2, 8, 384>}]} {
    %c0 = arith.constant 0 : index
    %c0_0 = arith.constant 0 : index
    %c0_1 = arith.constant 0 : index
    %0 = vector.load %arg1[%c0, %c0_0, %c0_1] : memref<2x8x512xf32, #tpu.memory_space<vmem>>, vector<1x8x512xf32>
    %1 = vector.shape_cast %0 : vector<1x8x512xf32> to vector<8x512xf32>
    %2 = vector.extract_strided_slice %1 {offsets = [0, 0], sizes = [8, 384], strides = [1, 1]} : vector<8x512xf32> to vector<8x384xf32>
    %c0_2 = arith.constant 0 : index
    %c0_3 = arith.constant 0 : index
    %3 = vector.load %arg5[%c0_2, %c0_3] : memref<72x768xf32, #tpu.memory_space<vmem>>, vector<8x384xf32>
    tpu.vector_store %arg5[%c0_2, %c0_3], %2 {strides = array<i32>} : memref<72x768xf32, #tpu.memory_space<vmem>>, vector<8x384xf32>,
    %4 = vector.extract_strided_slice %1 {offsets = [0, 1], sizes = [8, 384], strides = [1, 1]} : vector<8x512xf32> to vector<8x384xf32>
    %c8 = arith.constant 8 : index
    %c0_4 = arith.constant 0 : index
    %5 = vector.load %arg5[%c8, %c0_4] : memref<72x768xf32, #tpu.memory_space<vmem>>, vector<8x384xf32>
    tpu.vector_store %arg5[%c8, %c0_4], %4 {strides = array<i32>} : memref<72x768xf32, #tpu.memory_space<vmem>>, vector<8x384xf32>,
    %6 = vector.extract_strided_slice %1 {offsets = [0, 2], sizes = [8, 384], strides = [1, 1]} : vector<8x512xf32> to vector<8x384xf32>
    %c16 = arith.constant 16 : index
    %c0_5 = arith.constant 0 : index
    %7 = vector.load %arg5[%c16, %c0_5] : memref<72x768xf32, #tpu.memory_space<vmem>>, vector<8x384xf32>
    tpu.vector_store %arg5[%c16, %c0_5], %6 {strides = array<i32>} : memref<72x768xf32, #tpu.memory_space<vmem>>, vector<8x384xf32>,
    %8 = vector.extract_strided_slice %1 {offsets = [0, 18], sizes = [8, 384], strides = [1, 1]} : vector<8x512xf32> to vector<8x384xf32>
    %c24 = arith.constant 24 : index
    %c0_6 = arith.constant 0 : index
    %9 = vector.load %arg5[%c24, %c0_6] : memref<72x768xf32, #tpu.memory_space<vmem>>, vector<8x384xf32>
    tpu.vector_store %arg5[%c24, %c0_6], %8 {strides = array<i32>} : memref<72x768xf32, #tpu.memory_space<vmem>>, vector<8x384xf32>,
    %10 = vector.extract_strided_slice %1 {offsets = [0, 19], sizes = [8, 384], strides = [1, 1]} : vector<8x512xf32> to vector<8x384xf32>
    %c32 = arith.constant 32 : index
    %c0_7 = arith.constant 0 : index
    %11 = vector.load %arg5[%c32, %c0_7] : memref<72x768xf32, #tpu.memory_space<vmem>>, vector<8x384xf32>
    tpu.vector_store %arg5[%c32, %c0_7], %10 {strides = array<i32>} : memref<72x768xf32, #tpu.memory_space<vmem>>, vector<8x384xf32>,
    %12 = vector.extract_strided_slice %1 {offsets = [0, 20], sizes = [8, 384], strides = [1, 1]} : vector<8x512xf32> to vector<8x384xf32>
    %c40 = arith.constant 40 : index
    %c0_8 = arith.constant 0 : index
    %13 = vector.load %arg5[%c40, %c0_8] : memref<72x768xf32, #tpu.memory_space<vmem>>, vector<8x384xf32>
    tpu.vector_store %arg5[%c40, %c0_8], %12 {strides = array<i32>} : memref<72x768xf32, #tpu.memory_space<vmem>>, vector<8x384xf32>,
    %14 = vector.extract_strided_slice %1 {offsets = [0, 36], sizes = [8, 384], strides = [1, 1]} : vector<8x512xf32> to vector<8x384xf32>
    %c48 = arith.constant 48 : index
    %c0_9 = arith.constant 0 : index
    %15 = vector.load %arg5[%c48, %c0_9] : memref<72x768xf32, #tpu.memory_space<vmem>>, vector<8x384xf32>
    tpu.vector_store %arg5[%c48, %c0_9], %14 {strides = array<i32>} : memref<72x768xf32, #tpu.memory_space<vmem>>, vector<8x384xf32>,
    %16 = vector.extract_strided_slice %1 {offsets = [0, 37], sizes = [8, 384], strides = [1, 1]} : vector<8x512xf32> to vector<8x384xf32>
    %c56 = arith.constant 56 : index
    %c0_10 = arith.constant 0 : index
    %17 = vector.load %arg5[%c56, %c0_10] : memref<72x768xf32, #tpu.memory_space<vmem>>, vector<8x384xf32>
    tpu.vector_store %arg5[%c56, %c0_10], %16 {strides = array<i32>} : memref<72x768xf32, #tpu.memory_space<vmem>>, vector<8x384xf32>,
    %18 = vector.extract_strided_slice %1 {offsets = [0, 38], sizes = [8, 384], strides = [1, 1]} : vector<8x512xf32> to vector<8x384xf32>
    %c64 = arith.constant 64 : index
    %c0_11 = arith.constant 0 : index
    %19 = vector.load %arg5[%c64, %c0_11] : memref<72x768xf32, #tpu.memory_space<vmem>>, vector<8x384xf32>
    tpu.vector_store %arg5[%c64, %c0_11], %18 {strides = array<i32>} : memref<72x768xf32, #tpu.memory_space<vmem>>, vector<8x384xf32>,
    %c1 = arith.constant 1 : index
    %c0_12 = arith.constant 0 : index
    %c0_13 = arith.constant 0 : index
    %20 = vector.load %arg1[%c1, %c0_12, %c0_13] : memref<2x8x512xf32, #tpu.memory_space<vmem>>, vector<1x8x512xf32>
    %21 = vector.shape_cast %20 : vector<1x8x512xf32> to vector<8x512xf32>
    %22 = vector.extract_strided_slice %21 {offsets = [0, 0], sizes = [8, 384], strides = [1, 1]} : vector<8x512xf32> to vector<8x384xf32>
    %c0_14 = arith.constant 0 : index
    %c384 = arith.constant 384 : index
    %23 = vector.load %arg5[%c0_14, %c384] : memref<72x768xf32, #tpu.memory_space<vmem>>, vector<8x384xf32>
    tpu.vector_store %arg5[%c0_14, %c384], %22 {strides = array<i32>} : memref<72x768xf32, #tpu.memory_space<vmem>>, vector<8x384xf32>,
    %24 = vector.extract_strided_slice %21 {offsets = [0, 1], sizes = [8, 384], strides = [1, 1]} : vector<8x512xf32> to vector<8x384xf32>
    %c8_15 = arith.constant 8 : index
    %c384_16 = arith.constant 384 : index
    %25 = vector.load %arg5[%c8_15, %c384_16] : memref<72x768xf32, #tpu.memory_space<vmem>>, vector<8x384xf32>
    tpu.vector_store %arg5[%c8_15, %c384_16], %24 {strides = array<i32>} : memref<72x768xf32, #tpu.memory_space<vmem>>, vector<8x384xf32>,
    %26 = vector.extract_strided_slice %21 {offsets = [0, 2], sizes = [8, 384], strides = [1, 1]} : vector<8x512xf32> to vector<8x384xf32>
    %c16_17 = arith.constant 16 : index
    %c384_18 = arith.constant 384 : index
    %27 = vector.load %arg5[%c16_17, %c384_18] : memref<72x768xf32, #tpu.memory_space<vmem>>, vector<8x384xf32>
    tpu.vector_store %arg5[%c16_17, %c384_18], %26 {strides = array<i32>} : memref<72x768xf32, #tpu.memory_space<vmem>>, vector<8x384xf32>,
    %28 = vector.extract_strided_slice %21 {offsets = [0, 18], sizes = [8, 384], strides = [1, 1]} : vector<8x512xf32> to vector<8x384xf32>
    %c24_19 = arith.constant 24 : index
    %c384_20 = arith.constant 384 : index
    %29 = vector.load %arg5[%c24_19, %c384_20] : memref<72x768xf32, #tpu.memory_space<vmem>>, vector<8x384xf32>
    tpu.vector_store %arg5[%c24_19, %c384_20], %28 {strides = array<i32>} : memref<72x768xf32, #tpu.memory_space<vmem>>, vector<8x384xf32>,
    %30 = vector.extract_strided_slice %21 {offsets = [0, 19], sizes = [8, 384], strides = [1, 1]} : vector<8x512xf32> to vector<8x384xf32>
    %c32_21 = arith.constant 32 : index
    %c384_22 = arith.constant 384 : index
    %31 = vector.load %arg5[%c32_21, %c384_22] : memref<72x768xf32, #tpu.memory_space<vmem>>, vector<8x384xf32>
    tpu.vector_store %arg5[%c32_21, %c384_22], %30 {strides = array<i32>} : memref<72x768xf32, #tpu.memory_space<vmem>>, vector<8x384xf32>,
    %32 = vector.extract_strided_slice %21 {offsets = [0, 20], sizes = [8, 384], strides = [1, 1]} : vector<8x512xf32> to vector<8x384xf32>
    %c40_23 = arith.constant 40 : index
    %c384_24 = arith.constant 384 : index
    %33 = vector.load %arg5[%c40_23, %c384_24] : memref<72x768xf32, #tpu.memory_space<vmem>>, vector<8x384xf32>
    tpu.vector_store %arg5[%c40_23, %c384_24], %32 {strides = array<i32>} : memref<72x768xf32, #tpu.memory_space<vmem>>, vector<8x384xf32>,
    %34 = vector.extract_strided_slice %21 {offsets = [0, 36], sizes = [8, 384], strides = [1, 1]} : vector<8x512xf32> to vector<8x384xf32>
    %c48_25 = arith.constant 48 : index
    %c384_26 = arith.constant 384 : index
    %35 = vector.load %arg5[%c48_25, %c384_26] : memref<72x768xf32, #tpu.memory_space<vmem>>, vector<8x384xf32>
    tpu.vector_store %arg5[%c48_25, %c384_26], %34 {strides = array<i32>} : memref<72x768xf32, #tpu.memory_space<vmem>>, vector<8x384xf32>,
    %36 = vector.extract_strided_slice %21 {offsets = [0, 37], sizes = [8, 384], strides = [1, 1]} : vector<8x512xf32> to vector<8x384xf32>
    %c56_27 = arith.constant 56 : index
    %c384_28 = arith.constant 384 : index
    %37 = vector.load %arg5[%c56_27, %c384_28] : memref<72x768xf32, #tpu.memory_space<vmem>>, vector<8x384xf32>
    tpu.vector_store %arg5[%c56_27, %c384_28], %36 {strides = array<i32>} : memref<72x768xf32, #tpu.memory_space<vmem>>, vector<8x384xf32>,
    %38 = vector.extract_strided_slice %21 {offsets = [0, 38], sizes = [8, 384], strides = [1, 1]} : vector<8x512xf32> to vector<8x384xf32>
    %c64_29 = arith.constant 64 : index
    %c384_30 = arith.constant 384 : index
    %39 = vector.load %arg5[%c64_29, %c384_30] : memref<72x768xf32, #tpu.memory_space<vmem>>, vector<8x384xf32>
    tpu.vector_store %arg5[%c64_29, %c384_30], %38 {strides = array<i32>} : memref<72x768xf32, #tpu.memory_space<vmem>>, vector<8x384xf32>,
    %c0_31 = arith.constant 0 : index
    %c0_32 = arith.constant 0 : index
    %40 = vector.load %arg2[%c0_31, %c0_32] : memref<8x72xf32, #tpu.memory_space<vmem>>, vector<8x72xf32>
    %c0_33 = arith.constant 0 : index
    %c0_34 = arith.constant 0 : index
    %41 = vector.load %arg5[%c0_33, %c0_34] : memref<72x768xf32, #tpu.memory_space<vmem>>, vector<72x768xf32>
    %cst = arith.constant dense<0.000000e+00> : vector<8x768xf32>
    %42 = tpu.matmul %40, %41, %cst {dimension_numbers = #tpu.dot_dimension_numbers<[1], [0], [0], [1], [0, 0, 1, 1], [], []>} : vector<8x72xf32>, vector<72x768xf32>, vector<8x768xf32> -> vector<8x768xf32>
    %c0_35 = arith.constant 0 : index
    %c0_36 = arith.constant 0 : index
    %43 = vector.load %arg3[%c0_35, %c0_36] : memref<1x384xf32, #tpu.memory_space<vmem>>, vector<1x384xf32>
    %44 = vector.extract_strided_slice %42 {offsets = [0, 0], sizes = [8, 384], strides = [1, 1]} : vector<8x768xf32> to vector<8x384xf32>
    %45 = vector.broadcast %43 : vector<1x384xf32> to vector<8x384xf32>
    %46 = arith.mulf %44, %45 : vector<8x384xf32>
    %cst_37 = arith.constant dense<0.000000e+00> : vector<8xf32>
    %47 = vector.multi_reduction <add>, %46, %cst_37 [1] : vector<8x384xf32> to vector<8xf32>
    %48 = vector.shape_cast %47 : vector<8xf32> to vector<8x1xf32>
    %cst_38 = arith.constant 3.906250e-03 : f32
    %49 = vector.broadcast %cst_38 : f32 to vector<8x1xf32>
    %50 = arith.mulf %48, %49 : vector<8x1xf32>
    %51 = arith.mulf %44, %44 : vector<8x384xf32>
    %52 = vector.broadcast %43 : vector<1x384xf32> to vector<8x384xf32>
    %53 = arith.mulf %51, %52 : vector<8x384xf32>
    %cst_39 = arith.constant dense<0.000000e+00> : vector<8xf32>
    %54 = vector.multi_reduction <add>, %53, %cst_39 [1] : vector<8x384xf32> to vector<8xf32>
    %55 = vector.shape_cast %54 : vector<8xf32> to vector<8x1xf32>
    %cst_40 = arith.constant 3.906250e-03 : f32
    %56 = vector.broadcast %cst_40 : f32 to vector<8x1xf32>
    %57 = arith.mulf %55, %56 : vector<8x1xf32>
    %58 = arith.mulf %50, %50 : vector<8x1xf32>
    %59 = arith.subf %57, %58 : vector<8x1xf32>
    %cst_41 = arith.constant 0.000000e+00 : f32
    %60 = vector.broadcast %cst_41 : f32 to vector<8x1xf32>
    %61 = arith.maximumf %59, %60 : vector<8x1xf32>
    %62 = vector.broadcast %50 : vector<8x1xf32> to vector<8x384xf32>
    %63 = arith.subf %44, %62 : vector<8x384xf32>
    %cst_42 = arith.constant 9.99999974E-6 : f32
    %64 = vector.broadcast %cst_42 : f32 to vector<8x1xf32>
    %65 = arith.addf %61, %64 : vector<8x1xf32>
    %66 = math.rsqrt %65 : vector<8x1xf32>
    %67 = vector.broadcast %66 : vector<8x1xf32> to vector<8x384xf32>
    %68 = arith.mulf %63, %67 : vector<8x384xf32>
    %cst_43 = arith.constant 0.000000e+00 : f32
    %69 = vector.broadcast %cst_43 : f32 to vector<8x384xf32>
    %70 = arith.maximumf %68, %69 : vector<8x384xf32>
    %c0_44 = arith.constant 0 : index
    %c0_45 = arith.constant 0 : index
    %c0_46 = arith.constant 0 : index
    %71 = vector.load %arg4[%c0_44, %c0_45, %c0_46] : memref<2x8x384xf32, #tpu.memory_space<vmem>>, vector<1x8x384xf32>
    %72 = vector.shape_cast %71 : vector<1x8x384xf32> to vector<8x384xf32>
    %73 = vector.shape_cast %70 : vector<8x384xf32> to vector<1x8x384xf32>
    tpu.vector_store %arg4[%c0_44, %c0_45, %c0_46], %73 {strides = array<i32>} : memref<2x8x384xf32, #tpu.memory_space<vmem>>, vector<1x8x384xf32>,
    %74 = vector.extract_strided_slice %42 {offsets = [0, 384], sizes = [8, 384], strides = [1, 1]} : vector<8x768xf32> to vector<8x384xf32>
    %75 = vector.broadcast %43 : vector<1x384xf32> to vector<8x384xf32>
    %76 = arith.mulf %74, %75 : vector<8x384xf32>
    %cst_47 = arith.constant dense<0.000000e+00> : vector<8xf32>
    %77 = vector.multi_reduction <add>, %76, %cst_47 [1] : vector<8x384xf32> to vector<8xf32>
    %78 = vector.shape_cast %77 : vector<8xf32> to vector<8x1xf32>
    %cst_48 = arith.constant 3.906250e-03 : f32
    %79 = vector.broadcast %cst_48 : f32 to vector<8x1xf32>
    %80 = arith.mulf %78, %79 : vector<8x1xf32>
    %81 = arith.mulf %74, %74 : vector<8x384xf32>
    %82 = vector.broadcast %43 : vector<1x384xf32> to vector<8x384xf32>
    %83 = arith.mulf %81, %82 : vector<8x384xf32>
    %cst_49 = arith.constant dense<0.000000e+00> : vector<8xf32>
    %84 = vector.multi_reduction <add>, %83, %cst_49 [1] : vector<8x384xf32> to vector<8xf32>
    %85 = vector.shape_cast %84 : vector<8xf32> to vector<8x1xf32>
    %cst_50 = arith.constant 3.906250e-03 : f32
    %86 = vector.broadcast %cst_50 : f32 to vector<8x1xf32>
    %87 = arith.mulf %85, %86 : vector<8x1xf32>
    %88 = arith.mulf %80, %80 : vector<8x1xf32>
    %89 = arith.subf %87, %88 : vector<8x1xf32>
    %cst_51 = arith.constant 0.000000e+00 : f32
    %90 = vector.broadcast %cst_51 : f32 to vector<8x1xf32>
    %91 = arith.maximumf %89, %90 : vector<8x1xf32>
    %92 = vector.broadcast %80 : vector<8x1xf32> to vector<8x384xf32>
    %93 = arith.subf %74, %92 : vector<8x384xf32>
    %cst_52 = arith.constant 9.99999974E-6 : f32
    %94 = vector.broadcast %cst_52 : f32 to vector<8x1xf32>
    %95 = arith.addf %91, %94 : vector<8x1xf32>
    %96 = math.rsqrt %95 : vector<8x1xf32>
    %97 = vector.broadcast %96 : vector<8x1xf32> to vector<8x384xf32>
    %98 = arith.mulf %93, %97 : vector<8x384xf32>
    %cst_53 = arith.constant 0.000000e+00 : f32
    %99 = vector.broadcast %cst_53 : f32 to vector<8x384xf32>
    %100 = arith.maximumf %98, %99 : vector<8x384xf32>
    %c1_54 = arith.constant 1 : index
    %c0_55 = arith.constant 0 : index
    %c0_56 = arith.constant 0 : index
    %101 = vector.load %arg4[%c1_54, %c0_55, %c0_56] : memref<2x8x384xf32, #tpu.memory_space<vmem>>, vector<1x8x384xf32>
    %102 = vector.shape_cast %101 : vector<1x8x384xf32> to vector<8x384xf32>
    %103 = vector.shape_cast %100 : vector<8x384xf32> to vector<1x8x384xf32>
    tpu.vector_store %arg4[%c1_54, %c0_55, %c0_56], %103 {strides = array<i32>} : memref<2x8x384xf32, #tpu.memory_space<vmem>>, vector<1x8x384xf32>,
    return
  }
  func.func @transform_0(%arg0: i32) -> (i32, i32, i32) {
    %c0_i32 = arith.constant 0 : i32
    %c0_i32_0 = arith.constant 0 : i32
    %c0_i32_1 = arith.constant 0 : i32
    return %arg0, %c0_i32, %c0_i32_0 : i32, i32, i32
  }
  func.func @transform_1(%arg0: i32) -> (i32, i32) {
    %c0_i32 = arith.constant 0 : i32
    %c0_i32_0 = arith.constant 0 : i32
    %c0_i32_1 = arith.constant 0 : i32
    return %c0_i32, %c0_i32_0 : i32, i32
  }
  func.func @transform_2(%arg0: i32) -> (i32, i32) {
    %c0_i32 = arith.constant 0 : i32
    %c0_i32_0 = arith.constant 0 : i32
    %c0_i32_1 = arith.constant 0 : i32
    return %c0_i32, %c0_i32_0 : i32, i32
  }
  func.func @transform_3(%arg0: i32) -> (i32, i32, i32) {
    %c0_i32 = arith.constant 0 : i32
    %c0_i32_0 = arith.constant 0 : i32
    %c0_i32_1 = arith.constant 0 : i32
    return %arg0, %c0_i32, %c0_i32_0 : i32, i32, i32
  }
}

</mosaic_0001>

<bundles_post_ra>
// kernel: conv_block.1
= control target key start
LH: loop header
LB: loop body
LE: loop exit
PB: predicated region body
PF: predicated region fallthrough
CT: control target
= control target key end

     0   :  { %s706_s16 = smov 90   ;;  %s707_s19 = smov 91   ;;  %v714_v5 = vmov 0.0   ;;  %vm159_vm0 = vcmask 736256   ;;  %vm141_vm1 = vcmask 744448   ;;  %vm123_vm2 = vcmask 752640   ;;  %s1010_s0 = inlined_call_operand.vmem [shape: f32[2,8,512], index: 0, kind: input, shape index: {}]   ;;  %s1011_s1 = inlined_call_operand.vmem [shape: f32[8,72], index: 1, kind: input, shape index: {}]   ;;  %s1012_s2 = inlined_call_operand.vmem [shape: f32[1,384], index: 2, kind: input, shape index: {}]   ;;  %s1013_s3 = inlined_call_operand.vmem [shape: f32[2,8,384], index: 3, kind: output, shape index: {}]  }
   0x1   :  { %v738_v0 = vld [vmem:[%s1010_s0 + $0x8] sm:$0xff]  ;;  %v743_v1 = vld [vmem:[%s1010_s0] sm:$0xff]  ;;  %v752_v2 = vld [vmem:[%s1010_s0 + $0x10] sm:$0xff]  ;;  %s708_s20 = smov 92   ;;  %s709_s21 = smov 108   ;;  %440 = vmatprep.mubr.f32.mxu0 %v714_v5  ;;  %511 = vmatprep.mubr.f32.mxu1 %v714_v5  ;;  %vm105_vm3 = vcmask 883712  }
   0x2   :  { %153 = vrot.lane.b32.xlu0 %v738_v0, %s706_s16  ;;  %151 = vrot.lane.b32.xlu1 %v743_v1, %s706_s16  ;;  %s710_s22 = smov 109   ;;  %s711_s23 = smov 110   ;;  %v801_v3 = vld [vmem:[%s1010_s0 + $0x20] sm:$0xff]  ;;  %v806_v4 = vld [vmem:[%s1010_s0 + $0x28] sm:$0xff]  ;;  %vm87_vm4 = vcmask 891904   ;;  %vm69_vm5 = vcmask 900096  }
   0x3   :  { %s712_s24 = smov 126   ;;  %s713_s25 = smov 127   ;;  %v17_v6 = vld [vmem:[%s1010_s0 + $0x18] sm:$0xff]  ;;  %v823_v7 = vld [vmem:[%s1010_s0 + $0x30] sm:$0xff]  ;;  %vm51_vm6 = vcmask 1031168   ;;  %vm33_vm7 = vcmask 1039360  }
   0x4   :  { %v686_v8 = vld [vmem:[%s1010_s0 + $0x38] sm:$0xff]  ;;  %v928_v49 = vld [vmem:[%s1011_s1] sm:$0xff]  ;;  %vm372_vm8 = vcmask 588800  }
   0x6   :  { %155 = vrot.lane.b32.xlu0 %v752_v2, %s706_s16  ;;  %135 = vrot.lane.b32.xlu1 %v738_v0, %s707_s19 }
   0xa   :  { %137 = vrot.lane.b32.xlu0 %v752_v2, %s707_s19  ;;  %133 = vrot.lane.b32.xlu1 %v743_v1, %s707_s19 }
   0xe   :  { %117 = vrot.lane.b32.xlu0 %v738_v0, %s708_s20  ;;  %119 = vrot.lane.b32.xlu1 %v752_v2, %s708_s20 }
  0x12   :  { %115 = vrot.lane.b32.xlu0 %v743_v1, %s708_s20  ;;  %99 = vrot.lane.b32.xlu1 %v738_v0, %s709_s21 }
  0x16   :  { %101 = vrot.lane.b32.xlu0 %v752_v2, %s709_s21  ;;  %97 = vrot.lane.b32.xlu1 %v743_v1, %s709_s21 }
  0x1a   :  { %81 = vrot.lane.b32.xlu0 %v738_v0, %s710_s22  ;;  %83 = vrot.lane.b32.xlu1 %v752_v2, %s710_s22 }
  0x1e   :  { %79 = vrot.lane.b32.xlu0 %v743_v1, %s710_s22  ;;  %63 = vrot.lane.b32.xlu1 %v738_v0, %s711_s23 }
  0x22   :  { %65 = vrot.lane.b32.xlu0 %v752_v2, %s711_s23  ;;  %61 = vrot.lane.b32.xlu1 %v743_v1, %s711_s23 }
  0x26   :  { %45 = vrot.lane.b32.xlu0 %v738_v0, %s712_s24  ;;  %47 = vrot.lane.b32.xlu1 %v752_v2, %s712_s24 }
  0x2a   :  { %43 = vrot.lane.b32.xlu0 %v743_v1, %s712_s24  ;;  %27 = vrot.lane.b32.xlu1 %v738_v0, %s713_s25 }
  0x2e   :  { %29 = vrot.lane.b32.xlu0 %v752_v2, %s713_s25  ;;  %25 = vrot.lane.b32.xlu1 %v743_v1, %s713_s25 }
  0x32   :  { %300 = vrot.lane.b32.xlu0 %v801_v3, %s706_s16  ;;  %302 = vrot.lane.b32.xlu1 %v806_v4, %s706_s16 }
  0x36   :  { %157 = vrot.lane.b32.xlu0 %v17_v6, %s706_s16  ;;  %283 = vrot.lane.b32.xlu1 %v801_v3, %s707_s19 }
  0x3a   :  { %285 = vrot.lane.b32.xlu0 %v806_v4, %s707_s19  ;;  %304 = vrot.lane.b32.xlu1 %v823_v7, %s706_s16 }
  0x3e   :  { %306 = vrot.lane.b32.xlu0 %v686_v8, %s706_s16  ;;  %139 = vrot.lane.b32.xlu1 %v17_v6, %s707_s19 }
  0x42   :  { %266 = vrot.lane.b32.xlu0 %v801_v3, %s708_s20  ;;  %268 = vrot.lane.b32.xlu1 %v806_v4, %s708_s20 }
  0x46   :  { %287 = vrot.lane.b32.xlu0 %v823_v7, %s707_s19  ;;  %289 = vrot.lane.b32.xlu1 %v686_v8, %s707_s19 }
  0x4a   :  { %121 = vrot.lane.b32.xlu0 %v17_v6, %s708_s20  ;;  %249 = vrot.lane.b32.xlu1 %v801_v3, %s709_s21 }
  0x4e   :  { %251 = vrot.lane.b32.xlu0 %v806_v4, %s709_s21  ;;  %270 = vrot.lane.b32.xlu1 %v823_v7, %s708_s20 }
  0x52   :  { %272 = vrot.lane.b32.xlu0 %v686_v8, %s708_s20  ;;  %103 = vrot.lane.b32.xlu1 %v17_v6, %s709_s21 }
  0x56   :  { %232 = vrot.lane.b32.xlu0 %v801_v3, %s710_s22  ;;  %234 = vrot.lane.b32.xlu1 %v806_v4, %s710_s22 }
  0x5a   :  { %253 = vrot.lane.b32.xlu0 %v823_v7, %s709_s21  ;;  %255 = vrot.lane.b32.xlu1 %v686_v8, %s709_s21 }
  0x5e   :  { %85 = vrot.lane.b32.xlu0 %v17_v6, %s710_s22  ;;  %215 = vrot.lane.b32.xlu1 %v801_v3, %s711_s23 }
  0x62   :  { %217 = vrot.lane.b32.xlu0 %v806_v4, %s711_s23  ;;  %236 = vrot.lane.b32.xlu1 %v823_v7, %s710_s22 }
  0x66   :  { %238 = vrot.lane.b32.xlu0 %v686_v8, %s710_s22  ;;  %67 = vrot.lane.b32.xlu1 %v17_v6, %s711_s23 }
  0x6a   :  { %198 = vrot.lane.b32.xlu0 %v801_v3, %s712_s24  ;;  %200 = vrot.lane.b32.xlu1 %v806_v4, %s712_s24 }
  0x6e   :  { %219 = vrot.lane.b32.xlu0 %v823_v7, %s711_s23  ;;  %221 = vrot.lane.b32.xlu1 %v686_v8, %s711_s23 }
  0x72   :  { %49 = vrot.lane.b32.xlu0 %v17_v6, %s712_s24  ;;  %181 = vrot.lane.b32.xlu1 %v801_v3, %s713_s25 }
  0x74   :  { %v154_v9 = vpop.permute.xlu0 %153  ;;  %v152_v10 = vpop.permute.xlu1 %151 }
  0x75   :  { %v160_v14 = vsel %vm159_vm0, %v152_v10, %v154_v9 }
  0x76   :  { %183 = vrot.lane.b32.xlu0 %v806_v4, %s713_s25  ;;  %202 = vrot.lane.b32.xlu1 %v823_v7, %s712_s24 }
  0x78   :  { %v880_v11 = vpop.permute.xlu0 %155  ;;  %v136_v12 = vpop.permute.xlu1 %135 }
  0x79   :  { %v161_v13 = vsel %vm159_vm0, %v154_v9, %v880_v11 }
  0x7a   :  { %390 = vmatprep.subr.mxu0 %v161_v13  ;;  %204 = vrot.lane.b32.xlu0 %v686_v8, %s712_s24 }
  0x7b   :  { %31 = vrot.lane.b32.xlu1 %v17_v6, %s713_s25  ;;  %391 = vmatpush1.msra.mxu0 %v160_v14 }
  0x7c   :  { %v887_v15 = vpop.permute.xlu0 %137  ;;  %v134_v16 = vpop.permute.xlu1 %133 }
  0x7d   :  { %v143_v17 = vsel %vm141_vm1, %v136_v12, %v887_v15  ;;  %v142_v18 = vsel %vm141_vm1, %v134_v16, %v136_v12 }
  0x7e   :  { %185 = vrot.lane.b32.xlu0 %v823_v7, %s713_s25  ;;  %392 = vmatprep.subr.mxu0 %v143_v17 }
  0x7f   :  { %187 = vrot.lane.b32.xlu1 %v686_v8, %s713_s25  ;;  %393 = vmatpush1.msra.mxu0 %v142_v18 }
  0x80   :  { %v118_v19 = vpop.permute.xlu0 %117  ;;  %v895_v20 = vpop.permute.xlu1 %119 }
  0x81   :  { %v125_v21 = vsel %vm123_vm2, %v118_v19, %v895_v20 }
  0x82   :  { %394 = vmatprep.subr.mxu0 %v125_v21 }
  0x84   :  { %v116_v22 = vpop.permute.xlu0 %115  ;;  %v100_v23 = vpop.permute.xlu1 %99 }
  0x85   :  { %v124_v24 = vsel %vm123_vm2, %v116_v22, %v118_v19 }
  0x86   :  { %395 = vmatpush1.msra.mxu0 %v124_v24 }
  0x88   :  { %v900_v25 = vpop.permute.xlu0 %101  ;;  %v98_v26 = vpop.permute.xlu1 %97 }
  0x89   :  { %v107_v27 = vsel %vm105_vm3, %v100_v23, %v900_v25  ;;  %v106_v28 = vsel %vm105_vm3, %v98_v26, %v100_v23 }
  0x8a   :  { %396 = vmatprep.subr.mxu0 %v107_v27 }
  0x8b   :  { %397 = vmatpush1.msra.mxu0 %v106_v28 }
  0x8c   :  { %v82_v29 = vpop.permute.xlu0 %81  ;;  %v905_v30 = vpop.permute.xlu1 %83 }
  0x8d   :  { %v89_v31 = vsel %vm87_vm4, %v82_v29, %v905_v30 }
  0x8e   :  { %398 = vmatprep.subr.mxu0 %v89_v31 }
  0x90   :  { %v80_v32 = vpop.permute.xlu0 %79  ;;  %v64_v33 = vpop.permute.xlu1 %63 }
  0x91   :  { %v88_v34 = vsel %vm87_vm4, %v80_v32, %v82_v29 }
  0x92   :  { %399 = vmatpush1.msra.mxu0 %v88_v34 }
  0x94   :  { %v910_v35 = vpop.permute.xlu0 %65  ;;  %v62_v36 = vpop.permute.xlu1 %61 }
  0x95   :  { %v71_v37 = vsel %vm69_vm5, %v64_v33, %v910_v35  ;;  %v70_v38 = vsel %vm69_vm5, %v62_v36, %v64_v33 }
  0x96   :  { %400 = vmatprep.subr.mxu0 %v71_v37 }
  0x97   :  { %401 = vmatpush1.msra.mxu0 %v70_v38 }
  0x98   :  { %v46_v39 = vpop.permute.xlu0 %45  ;;  %v915_v40 = vpop.permute.xlu1 %47 }
  0x99   :  { %v53_v41 = vsel %vm51_vm6, %v46_v39, %v915_v40 }
  0x9a   :  { %402 = vmatprep.subr.mxu0 %v53_v41 }
  0x9c   :  { %v44_v42 = vpop.permute.xlu0 %43  ;;  %v28_v43 = vpop.permute.xlu1 %27 }
  0x9d   :  { %v52_v44 = vsel %vm51_vm6, %v44_v42, %v46_v39 }
  0x9e   :  { %403 = vmatpush1.msra.mxu0 %v52_v44 }
  0xa0   :  { %v920_v45 = vpop.permute.xlu0 %29  ;;  %v26_v46 = vpop.permute.xlu1 %25 }
  0xa1   :  { %v35_v47 = vsel %vm33_vm7, %v28_v43, %v920_v45  ;;  %v34_v48 = vsel %vm33_vm7, %v26_v46, %v28_v43 }
  0xa2   :  { %404 = vmatprep.subr.mxu0 %v35_v47 }
  0xa3   :  { %405 = vmatpush1.msra.mxu0 %v34_v48 }
  0xa4   :  { %v301_v50 = vpop.permute.xlu0 %300  ;;  %v303_v51 = vpop.permute.xlu1 %302  ;;  %406 = vmatprep.subr.mxu0 %v738_v0 }
  0xa5   :  { %v308_v52 = vsel %vm159_vm0, %v301_v50, %v303_v51  ;;  %407 = vmatpush1.msra.mxu0 %v743_v1 }
  0xa6   :  { %461 = vmatprep.subr.mxu1 %v308_v52  ;;  %687 = vmatmul.mubr.msk.f32.vlgmr.msra.gmra.mxu0 %vm372_vm8, %v928_v49 }
  0xa7   :  { %582 = vmatprep.mubr.f32.mxu0 %v714_v5 }
  0xa8   :  { %v158_v53 = vpop.permute.xlu0 %157  ;;  %v284_v54 = vpop.permute.xlu1 %283 }
  0xa9   :  { %v162_v55 = vsel %vm159_vm0, %v880_v11, %v158_v53 }
  0xaa   :  { %462 = vmatpush1.msra.mxu1 %v162_v55 }
  0xac   :  { %v286_v56 = vpop.permute.xlu0 %285  ;;  %v305_v57 = vpop.permute.xlu1 %304 }
  0xad   :  { %v291_v58 = vsel %vm141_vm1, %v284_v54, %v286_v56  ;;  %v309_v63 = vsel %vm159_vm0, %v303_v51, %v305_v57 }
  0xae   :  { %463 = vmatprep.subr.mxu1 %v291_v58 }
  0xb0   :  { %v307_v59 = vpop.permute.xlu0 %306  ;;  %v140_v60 = vpop.permute.xlu1 %139 }
  0xb1   :  { %v144_v61 = vsel %vm141_vm1, %v887_v15, %v140_v60  ;;  %v310_v62 = vsel %vm159_vm0, %v305_v57, %v307_v59 }
  0xb2   :  { %464 = vmatpush1.msra.mxu1 %v144_v61  ;;  %532 = vmatprep.subr.mxu0 %v310_v62 }
  0xb3   :  { %533 = vmatpush1.msra.mxu0 %v309_v63 }
  0xb4   :  { %v267_v0 = vpop.permute.xlu0 %266  ;;  %v269_v1 = vpop.permute.xlu1 %268 }
  0xb5   :  { %v274_v5 = vsel %vm123_vm2, %v267_v0, %v269_v1 }
  0xb6   :  { %465 = vmatprep.subr.mxu1 %v274_v5  ;;  %v589_v5 = vld [vmem:[%s1012_s2] sm:$0x7] }
  0xb8   :  { %v288_v6 = vpop.permute.xlu0 %287  ;;  %v290_v8 = vpop.permute.xlu1 %289 }
  0xb9   :  { %v292_v9 = vsel %vm141_vm1, %v286_v56, %v288_v6  ;;  %v293_v10 = vsel %vm141_vm1, %v288_v6, %v290_v8 }
  0xba   :  { %534 = vmatprep.subr.mxu0 %v293_v10 }
  0xbb   :  { %535 = vmatpush1.msra.mxu0 %v292_v9 }
  0xbc   :  { %v122_v11 = vpop.permute.xlu0 %121  ;;  %v250_v12 = vpop.permute.xlu1 %249 }
  0xbd   :  { %v126_v13 = vsel %vm123_vm2, %v895_v20, %v122_v11 }
  0xbe   :  { %466 = vmatpush1.msra.mxu1 %v126_v13 }
  0xc0   :  { %v252_v14 = vpop.permute.xlu0 %251  ;;  %v271_v15 = vpop.permute.xlu1 %270 }
  0xc1   :  { %v257_v16 = vsel %vm105_vm3, %v250_v12, %v252_v14  ;;  %v275_v22 = vsel %vm123_vm2, %v269_v1, %v271_v15 }
  0xc2   :  { %467 = vmatprep.subr.mxu1 %v257_v16 }
  0xc4   :  { %v273_v17 = vpop.permute.xlu0 %272  ;;  %v104_v18 = vpop.permute.xlu1 %103 }
  0xc5   :  { %v108_v19 = vsel %vm105_vm3, %v900_v25, %v104_v18  ;;  %v276_v21 = vsel %vm123_vm2, %v271_v15, %v273_v17 }
  0xc6   :  { %468 = vmatpush1.msra.mxu1 %v108_v19  ;;  %536 = vmatprep.subr.mxu0 %v276_v21 }
  0xc7   :  { %537 = vmatpush1.msra.mxu0 %v275_v22 }
  0xc8   :  { %v233_v23 = vpop.permute.xlu0 %232  ;;  %v235_v20 = vpop.permute.xlu1 %234 }
  0xc9   :  { %v240_v24 = vsel %vm87_vm4, %v233_v23, %v235_v20 }
  0xca   :  { %469 = vmatprep.subr.mxu1 %v240_v24 }
  0xcc   :  { %v254_v26 = vpop.permute.xlu0 %253  ;;  %v256_v27 = vpop.permute.xlu1 %255 }
  0xcd   :  { %v258_v28 = vsel %vm105_vm3, %v252_v14, %v254_v26  ;;  %v259_v29 = vsel %vm105_vm3, %v254_v26, %v256_v27 }
  0xce   :  { %538 = vmatprep.subr.mxu0 %v259_v29 }
  0xcf   :  { %539 = vmatpush1.msra.mxu0 %v258_v28 }
  0xd0   :  { %v86_v25 = vpop.permute.xlu0 %85  ;;  %v216_v31 = vpop.permute.xlu1 %215 }
  0xd1   :  { %v90_v32 = vsel %vm87_vm4, %v905_v30, %v86_v25 }
  0xd2   :  { %470 = vmatpush1.msra.mxu1 %v90_v32 }
  0xd4   :  { %v218_v33 = vpop.permute.xlu0 %217  ;;  %v237_v34 = vpop.permute.xlu1 %236 }
  0xd5   :  { %v223_v36 = vsel %vm69_vm5, %v216_v31, %v218_v33  ;;  %v241_v42 = vsel %vm87_vm4, %v235_v20, %v237_v34 }
  0xd6   :  { %471 = vmatprep.subr.mxu1 %v223_v36 }
  0xd8   :  { %v239_v37 = vpop.permute.xlu0 %238  ;;  %v68_v38 = vpop.permute.xlu1 %67 }
  0xd9   :  { %v72_v39 = vsel %vm69_vm5, %v910_v35, %v68_v38  ;;  %v242_v41 = vsel %vm87_vm4, %v237_v34, %v239_v37 }
  0xda   :  { %472 = vmatpush1.msra.mxu1 %v72_v39  ;;  %540 = vmatprep.subr.mxu0 %v242_v41 }
  0xdb   :  { %541 = vmatpush1.msra.mxu0 %v241_v42 }
  0xdc   :  { %v199_v43 = vpop.permute.xlu0 %198  ;;  %v201_v30 = vpop.permute.xlu1 %200 }
  0xdd   :  { %v206_v44 = vsel %vm51_vm6, %v199_v43, %v201_v30 }
  0xde   :  { %473 = vmatprep.subr.mxu1 %v206_v44 }
  0xe0   :  { %v220_v46 = vpop.permute.xlu0 %219  ;;  %v222_v47 = vpop.permute.xlu1 %221 }
  0xe1   :  { %v224_v48 = vsel %vm69_vm5, %v218_v33, %v220_v46  ;;  %v225_v50 = vsel %vm69_vm5, %v220_v46, %v222_v47 }
  0xe2   :  { %542 = vmatprep.subr.mxu0 %v225_v50 }
  0xe3   :  { %543 = vmatpush1.msra.mxu0 %v224_v48 }
  0xe4   :  { %v50_v35 = vpop.permute.xlu0 %49  ;;  %v182_v51 = vpop.permute.xlu1 %181 }
  0xe5   :  { %v54_v52 = vsel %vm51_vm6, %v915_v40, %v50_v35 }
  0xe6   :  { %474 = vmatpush1.msra.mxu1 %v54_v52 }
  0xe8   :  { %v184_v53 = vpop.permute.xlu0 %183  ;;  %v203_v54 = vpop.permute.xlu1 %202 }
  0xe9   :  { %v189_v55 = vsel %vm33_vm7, %v182_v51, %v184_v53  ;;  %v207_v59 = vsel %vm51_vm6, %v201_v30, %v203_v54 }
  0xea   :  { %475 = vmatprep.subr.mxu1 %v189_v55 }
  0xec   :  { %v205_v56 = vpop.permute.xlu0 %204 }
  0xed   :  { %v32_v57 = vpop.permute.xlu1 %31  ;;  %v208_v58 = vsel %vm51_vm6, %v203_v54, %v205_v56 }
  0xee   :  { %v36_v60 = vsel %vm33_vm7, %v920_v45, %v32_v57  ;;  %544 = vmatprep.subr.mxu0 %v208_v58 }
  0xef   :  { %476 = vmatpush1.msra.mxu1 %v36_v60  ;;  %545 = vmatpush1.msra.mxu0 %v207_v59 }
  0xf0   :  { %477 = vmatprep.subr.mxu1 %v801_v3  ;;  %v186_v40 = vpop.permute.xlu0 %185  ;;  %v591_v3 = vlaneseq }
  0xf1   :  { %v190_v61 = vsel %vm33_vm7, %v184_v53, %v186_v40  ;;  %478 = vmatpush1.msra.mxu1 %v752_v2  ;;  %v188_v62 = vpop.permute.xlu1 %187 }
  0xf2   :  { %688 = vmatmul.mubr.msk.f32.vlgmr.msra.gmra.mxu1 %vm372_vm8, %v928_v49  ;;  %v191_v63 = vsel %vm33_vm7, %v186_v40, %v188_v62  ;;  %v592_v45 = vshrl.u32 %v591_v3, 7 }
  0xf3   :  { %546 = vmatprep.subr.mxu0 %v191_v63 }
  0xf4   :  { %547 = vmatpush1.msra.mxu0 %v190_v61  ;;  %v593_v0 = vsub.s32 0, %v592_v45  ;;  %v597_v1 = vsub.s32 1, %v592_v45  ;;  %v601_v9 = vsub.s32 2, %v592_v45 }
  0xf5   :  { %548 = vmatprep.subr.mxu0 %v823_v7 }
  0xf6   :  { %549 = vmatpush1.msra.mxu0 %v806_v4  ;;  %v594_v6 = vrot.slane %v589_v5, %v593_v0  ;;  %v598_v8 = vrot.slane %v589_v5, %v597_v1  ;;  %v602_v12 = vrot.slane %v589_v5, %v601_v9 }
  0xf7   :  { %689 = vmatmul.mubr.msk.f32.vlgmr.msra.gmra.mxu0 %vm372_vm8, %v928_v49 }
 0x166   :  { %v983_v2 = vpop.f32.mrf.mxu0 }
 0x167   :  { %v614_v4 = vmul.f32 %v983_v2, %v983_v2  ;;  %v606_v7 = vmul.f32 %v594_v6, %v983_v2 }
 0x168   :  { %v444_v10 = vpop.f32.mrf.mxu0 }
 0x169   :  { %v607_v49 = vmul.f32 %v598_v8, %v444_v10  ;;  %v615_v11 = vmul.f32 %v444_v10, %v444_v10  ;;  %v617_v14 = vmul.f32 %v614_v4, %v594_v6 }
 0x16b   :  { %v609_v17 = vadd.f32 %v607_v49, %v606_v7  ;;  %v618_v18 = vmul.f32 %v615_v11, %v598_v8 }
 0x16d   :  { %v620_v24 = vadd.f32 %v618_v18, %v617_v14 }
 0x1b2   :  { %v513_v13 = vpop.f32.mrf.mxu1 }
 0x1b3   :  { %v616_v15 = vmul.f32 %v513_v13, %v513_v13  ;;  %v608_v16 = vmul.f32 %v602_v12, %v513_v13 }
 0x1b4   :  { %v515_v19 = vpop.f32.mrf.mxu1 }
 0x1b5   :  { %v650_v21 = vmul.f32 %v515_v19, %v515_v19  ;;  %v610_v22 = vadd.f32 %v609_v17, %v608_v16  ;;  %v619_v23 = vmul.f32 %v616_v15, %v602_v12  ;;  %v642_v26 = vmul.f32 %v594_v6, %v515_v19 }
 0x1b7   :  { %611 = vadd.xlane.f32.xlu0 %v610_v22  ;;  %v584_v20 = vpop.f32.mrf.mxu0  ;;  %v653_v29 = vmul.f32 %v650_v21, %v594_v6  ;;  %v621_v31 = vadd.f32 %v620_v24, %v619_v23 }
 0x1b8   :  { %v643_v27 = vmul.f32 %v598_v8, %v584_v20  ;;  %v651_v28 = vmul.f32 %v584_v20, %v584_v20 }
 0x1b9   :  { %v586_v25 = vpop.f32.mrf.mxu0 }
 0x1ba   :  { %v644_v32 = vmul.f32 %v602_v12, %v586_v25  ;;  %v652_v33 = vmul.f32 %v586_v25, %v586_v25  ;;  %v645_v34 = vadd.f32 %v643_v27, %v642_v26  ;;  %v654_v36 = vmul.f32 %v651_v28, %v598_v8 }
 0x1bb   :  { %622 = vadd.xlane.f32.xlu0 %v621_v31 }
 0x1bc   :  { %v646_v37 = vadd.f32 %v645_v34, %v644_v32  ;;  %v655_v38 = vmul.f32 %v652_v33, %v602_v12  ;;  %v656_v39 = vadd.f32 %v654_v36, %v653_v29 }
 0x1be   :  { %647 = vadd.xlane.f32.xlu1 %v646_v37  ;;  %v657_v41 = vadd.f32 %v656_v39, %v655_v38 }
 0x1c0   :  { %658 = vadd.xlane.f32.xlu0 %v657_v41 }
 0x240   :  { %v612_v42 = vpop.xlane.xlu0 %611 }
 0x241   :  { %v613_v43 = vmul.f32 0.00390625, %v612_v42 }
 0x243   :  { %v625_v44 = vmul.f32 %v613_v43, %v613_v43  ;;  %v628_v58 = vsub.f32 %v983_v2, %v613_v43  ;;  %v629_v59 = vsub.f32 %v444_v10, %v613_v43  ;;  %v630_v60 = vsub.f32 %v513_v13, %v613_v43 }
 0x244   :  { %v623_v30 = vpop.xlane.xlu0 %622 }
 0x245   :  { %v624_v46 = vmul.f32 0.00390625, %v623_v30 }
 0x247   :  { %v626_v47 = vsub.f32 %v624_v46, %v625_v44  ;;  %v648_v48 = vpop.xlane.xlu1 %647 }
 0x248   :  { %v649_v50 = vmul.f32 0.00390625, %v648_v48 }
 0x249   :  { %v627_v35 = vmax.f32 %v626_v47, 0.0  ;;  %v659_v51 = vpop.xlane.xlu0 %658 }
 0x24a   :  { %v660_v52 = vmul.f32 0.00390625, %v659_v51  ;;  %v661_v54 = vmul.f32 %v649_v50, %v649_v50  ;;  %v664_v1 = vsub.f32 %v515_v19, %v649_v50  ;;  %v665_v2 = vsub.f32 %v584_v20, %v649_v50 }
 0x24b   :  { %v631_v53 = vadd.f32 1e-05, %v627_v35  ;;  %v666_v5 = vsub.f32 %v586_v25, %v649_v50 }
 0x24c   :  { %v662_v55 = vsub.f32 %v660_v52, %v661_v54 }
 0x24d   :  { %702 = vrsqrt.f32 %v631_v53 }
 0x24e   :  { %v663_v56 = vmax.f32 %v662_v55, 0.0 }
 0x250   :  { %v667_v57 = vadd.f32 1e-05, %v663_v56 }
 0x252   :  { %704 = vrsqrt.f32 %v667_v57 }
 0x25a   :  { %v703_v40 = vpop.eup %702 }
 0x25b   :  { %v633_v61 = vmul.f32 %v703_v40, %v628_v58  ;;  %v634_v62 = vmul.f32 %v703_v40, %v629_v59  ;;  %v635_v63 = vmul.f32 %v703_v40, %v630_v60 }
 0x25d   :  { %v636_v3 = vmax.f32 %v633_v61, 0.0  ;;  %v637_v45 = vmax.f32 %v634_v62, 0.0  ;;  %v638_v0 = vmax.f32 %v635_v63, 0.0 }
 0x25f   :  { %639 = vst [vmem:[%s1013_s3] sm:$0xff] %v636_v3  ;;  %640 = vst [vmem:[%s1013_s3 + $0x8] sm:$0xff] %v637_v45  ;;  %v705_v6 = vpop.eup %704 }
 0x260   :  { %641 = vst [vmem:[%s1013_s3 + $0x10] sm:$0xff] %v638_v0  ;;  %v669_v8 = vmul.f32 %v705_v6, %v664_v1  ;;  %v670_v9 = vmul.f32 %v705_v6, %v665_v2  ;;  %v671_v10 = vmul.f32 %v705_v6, %v666_v5 }
 0x262   :  { %v672_v4 = vmax.f32 %v669_v8, 0.0  ;;  %v673_v7 = vmax.f32 %v670_v9, 0.0  ;;  %v674_v49 = vmax.f32 %v671_v10, 0.0 }
 0x264   :  { %690 = vst [vmem:[%s1013_s3 + $0x18] sm:$0xff] %v672_v4  ;;  %691 = vst [vmem:[%s1013_s3 + $0x20] sm:$0xff] %v673_v7 }
 0x265   :  { %692 = vst [vmem:[%s1013_s3 + $0x28] sm:$0xff] %v674_v49 }

</bundles_post_ra>
